<compile_context>
chip_gen: v7x
topology: tpu7x:2x2x1
jax: 0.10.0
libtpu: 0.0.40
codegen_flags: <defaults>
</compile_context>

<pallas_src>
import functools

import jax
import jax.numpy as jnp
from jax.experimental import pallas as pl
from jax.experimental.pallas import tpu as pltpu


def _general_relu_kernel(x_ref, o_ref, *, leak, sub, maxv, compute_dtype):
    x = x_ref[...].astype(compute_dtype)
    if leak is not None:
        # leaky_relu: x if x >= 0 else leak * x
        y = jnp.where(x >= 0, x, x * jnp.asarray(leak, compute_dtype))
    else:
        y = jnp.maximum(x, jnp.asarray(0, compute_dtype))
    if sub is not None:
        y = y - jnp.asarray(sub, compute_dtype)
    if maxv is not None:
        y = jnp.minimum(y, jnp.asarray(maxv, compute_dtype))
    o_ref[...] = y.astype(o_ref.dtype)


def _pick_block_rows(rows, pack, rows_budget, want_split):
    """Pack-aligned row-block size: prefer divisors of `rows` (no ragged tail)
    and an even grid count (clean 2-TensorCore split on v7x)."""
    rows_budget = max(pack, (rows_budget // pack) * pack)
    if rows <= rows_budget:
        if want_split and rows >= 2 * pack:
            # Two blocks so both v7x TCs have work (2nd block may be ragged).
            half = -(-((rows + 1) // 2) // pack) * pack
            return min(rows, half)
        return rows                      # single full-extent block
    # Search pack-aligned divisors of rows near the budget.
    best_div = None
    br = rows_budget
    lo = max(pack, rows_budget // 2)
    while br >= lo:
        if rows % br == 0:
            if (rows // br) % 2 == 0:
                return br                # clean divisor AND even grid
            if best_div is None:
                best_div = br            # clean divisor (odd grid)
        br -= pack
    if best_div is not None:
        return best_div
    return rows_budget                   # ragged last block, masked by Pallas


def _general_relu_impl(x, leak, sub, maxv, target_block_bytes, donate_input):
    orig_shape = x.shape
    dtype = x.dtype
    total = x.size
    itemsize = jnp.dtype(dtype).itemsize
    pack = max(8, 32 // itemsize)        # sublane packing: 8 f32, 16 bf16, 32 int8
    compute_dtype = dtype if jnp.issubdtype(dtype, jnp.floating) else jnp.float32

    # Generation-aware VMEM budget (v7x: 64 MiB per TC; v5e/v6e: 128 MiB).
    try:
        vmem_phys = int(pltpu.get_tpu_info().vmem_capacity_bytes)
    except Exception:
        vmem_phys = 64 << 20                       # conservative (v7x)
    vmem_cap = max(16 << 20, vmem_phys // 2)       # 32 MiB on v7x, 64 MiB on v5e/v6e
    block_budget = max(128 * 128 * itemsize, min(target_block_bytes, vmem_cap // 6))

    # --- Zero-copy 2D view (no pad, no trailing slice) ---------------------
    if total % 128 == 0:
        lanes = next(c for c in (2048, 1024, 512, 256, 128) if total % c == 0)
        x2d = x.reshape(total // lanes, lanes)
    else:
        # Keep the natural trailing dim: a full-extent lane block is always
        # legal even when it is not a multiple of 128.
        x2d = x.reshape(-1, orig_shape[-1]) if x.ndim >= 2 else x.reshape(1, total)

    rows, cols = x2d.shape
    row_bytes = cols * itemsize
    min_rows_block = rows if rows < pack else pack
    want_split = total * itemsize >= (1 << 20)     # worth feeding both v7x TCs

    if row_bytes * min_rows_block <= block_budget:
        block_cols = cols
        block_rows = _pick_block_rows(rows, pack, block_budget // row_bytes, want_split)
    else:
        # A minimal row group already exceeds the budget: tile the lane dim too.
        block_rows = min_rows_block
        cols_budget = max(128, (block_budget // (block_rows * itemsize)) // 128 * 128)
        if cols % 128 == 0:
            block_cols = min(cols, cols_budget)
        else:
            block_cols = min((cols // 128) * 128, cols_budget)

    grid = (pl.cdiv(rows, block_rows), pl.cdiv(cols, block_cols))
    block_bytes = block_rows * block_cols * itemsize
    # in + out, double-buffered (~4x block) + headroom, under the chip cap.
    vmem_limit = int(min(vmem_cap, max(16 << 20, 6 * block_bytes)))

    kernel = functools.partial(_general_relu_kernel, leak=leak, sub=sub, maxv=maxv,
                               compute_dtype=compute_dtype)

    out2d = pl.pallas_call(
        kernel,
        out_shape=jax.ShapeDtypeStruct((rows, cols), dtype),
        grid_spec=pl.GridSpec(
            grid=grid,
            in_specs=[pl.BlockSpec((block_rows, block_cols), lambda i, j: (i, j))],
            out_specs=pl.BlockSpec((block_rows, block_cols), lambda i, j: (i, j)),
        ),
        compiler_params=pltpu.CompilerParams(
            dimension_semantics=("parallel", "parallel"),
            vmem_limit_bytes=vmem_limit,
        ),
        # Matches PyTorch's in-place update when the caller can donate x.
        input_output_aliases={0: 0} if donate_input else {},
    )(x2d)

    return out2d.reshape(orig_shape)


@functools.partial(
    jax.jit,
    static_argnames=("leak", "sub", "maxv", "target_block_bytes", "donate_input"))
def general_relu(x, leak=None, sub=None, maxv=None, *,
                 target_block_bytes=4 << 20, donate_input=False):
    """Elementwise GeneralRelu on an arbitrarily-shaped array (e.g. NCHW)."""
    if x.size == 0:
        return x
    return _general_relu_impl(x, leak, sub, maxv, target_block_bytes, donate_input)


def general_relu_ref(x, leak=None, sub=None, maxv=None):
    y = jnp.where(x >= 0, x, x * leak) if leak is not None else jnp.maximum(x, 0)
    if sub is not None:
        y = y - sub
    if maxv is not None:
        y = jnp.minimum(y, maxv)
    return y


if __name__ == "__main__":
    key = jax.random.PRNGKey(0)
    # NCHW input, small shape (total=2048 -> zero-copy wide lane-dense path).
    x = jax.random.normal(key, (2, 4, 16, 16), dtype=jnp.float32) * 3.0

    # GeneralRelu with typical params: leak=0.1, sub=0.4, maxv=6.0
    leak, sub, maxv = 0.1, 0.4, 6.0
    out = jax.block_until_ready(general_relu(x, leak=leak, sub=sub, maxv=maxv))
    ref = general_relu_ref(x, leak=leak, sub=sub, maxv=maxv)
    assert out.shape == x.shape and out.dtype == x.dtype
    assert jnp.allclose(out, ref, atol=1e-6, rtol=1e-6), "mismatch vs reference"

    # Default path: plain ReLU, no sub/maxv.
    out2 = jax.block_until_ready(general_relu(x))
    assert jnp.allclose(out2, general_relu_ref(x), atol=1e-6, rtol=1e-6), "relu path"

    # Odd-sized input: zero-copy natural-shape fallback (no pad, no slice-back).
    x3 = jax.random.normal(jax.random.PRNGKey(1), (3, 5, 7, 11), dtype=jnp.float32)
    out3 = jax.block_until_ready(general_relu(x3, leak=0.2, sub=0.25, maxv=3.0))
    ref3 = general_relu_ref(x3, leak=0.2, sub=0.25, maxv=3.0)
    assert out3.shape == x3.shape
    assert jnp.allclose(out3, ref3, atol=1e-6, rtol=1e-6), "mismatch (odd-size path)"

    # Medium input (2 MiB): exercises the multi-block / even-grid (2-TC) path.
    x4 = jax.random.normal(jax.random.PRNGKey(2), (4, 32, 64, 64), dtype=jnp.float32)
    out4 = jax.block_until_ready(general_relu(x4, leak=leak, sub=sub, maxv=maxv))
    ref4 = general_relu_ref(x4, leak=leak, sub=sub, maxv=maxv)
    assert jnp.allclose(out4, ref4, atol=1e-6, rtol=1e-6), "mismatch (multi-block path)"

    print("KERNEL_OK")
</pallas_src>

<mosaic_0001>
module attributes {stable_mosaic.version = 11 : i64} {
  func.func @_general_relu_kernel(%arg0: i32, %arg1: i32, %arg2: memref<1x2048xf32, #tpu.memory_space<vmem>>, %arg3: memref<1x2048xf32, #tpu.memory_space<vmem>>) attributes {dimension_semantics = [#tpu.dimension_semantics<parallel>, #tpu.dimension_semantics<parallel>], iteration_bounds = array<i64: 1, 1>, scalar_prefetch = 0 : i64, scratch_operands = 0 : i64, tpu.core_type = #tpu.core_type<tc>, window_params = [{transform_indices = @transform_0, window_bounds = array<i64: 1, 2048>}, {transform_indices = @transform_1, window_bounds = array<i64: 1, 2048>}]} {
    %c0 = arith.constant 0 : index
    %c0_0 = arith.constant 0 : index
    %0 = vector.load %arg2[%c0, %c0_0] : memref<1x2048xf32, #tpu.memory_space<vmem>>, vector<1x2048xf32>
    %cst = arith.constant 0.000000e+00 : f32
    %1 = vector.broadcast %cst : f32 to vector<1x2048xf32>
    %2 = arith.cmpf oge, %0, %1 : vector<1x2048xf32>
    %cst_1 = arith.constant 1.000000e-01 : f32
    %3 = vector.broadcast %cst_1 : f32 to vector<1x2048xf32>
    %4 = arith.mulf %0, %3 : vector<1x2048xf32>
    %5 = arith.select %2, %0, %4 : vector<1x2048xi1>, vector<1x2048xf32>
    %cst_2 = arith.constant 4.000000e-01 : f32
    %6 = vector.broadcast %cst_2 : f32 to vector<1x2048xf32>
    %7 = arith.subf %5, %6 : vector<1x2048xf32>
    %cst_3 = arith.constant 6.000000e+00 : f32
    %8 = vector.broadcast %cst_3 : f32 to vector<1x2048xf32>
    %9 = arith.minimumf %7, %8 : vector<1x2048xf32>
    %c0_4 = arith.constant 0 : index
    %c0_5 = arith.constant 0 : index
    %10 = vector.load %arg3[%c0_4, %c0_5] : memref<1x2048xf32, #tpu.memory_space<vmem>>, vector<1x2048xf32>
    tpu.vector_store %arg3[%c0_4, %c0_5], %9 {strides = array<i32>} : memref<1x2048xf32, #tpu.memory_space<vmem>>, vector<1x2048xf32>,
    return
  }
  func.func @transform_0(%arg0: i32, %arg1: i32) -> (i32, i32) {
    %c0_i32 = arith.constant 0 : i32
    return %arg0, %arg1 : i32, i32
  }
  func.func @transform_1(%arg0: i32, %arg1: i32) -> (i32, i32) {
    %c0_i32 = arith.constant 0 : i32
    return %arg0, %arg1 : i32, i32
  }
}

</mosaic_0001>

<bundles_post_ra>
// kernel: general_relu.1
= control target key start
LH: loop header
LB: loop body
LE: loop exit
PB: predicated region body
PF: predicated region fallthrough
CT: control target
= control target key end

     0   :  { %s50_s0 = inlined_call_operand.vmem [shape: f32[1,2048], index: 0, kind: input, shape index: {}]   ;;  %s51_s1 = inlined_call_operand.vmem [shape: f32[1,2048], index: 1, kind: output, shape index: {}]  }
   0x1   :  { %v8_v0 = vld [vmem:[%s50_s0] sm:$0xff]  ;;  %v9_v1 = vld [vmem:[%s50_s0 + $0x8] sm:$0xff] }
   0x2   :  { %vm10_vm0 = vcmp.ge.f32.partialorder %v8_v0, 0.0  ;;  %v12_v2 = vmul.f32 0.1, %v8_v0  ;;  %vm11_vm1 = vcmp.ge.f32.partialorder %v9_v1, 0.0  ;;  %v13_v3 = vmul.f32 0.1, %v9_v1 }
   0x4   :  { %v14_v4 = vsel %vm10_vm0, %v8_v0, %v12_v2  ;;  %v15_v5 = vsel %vm11_vm1, %v9_v1, %v13_v3 }
   0x5   :  { %v26_v6 = vadd.f32 -0.4, %v14_v4  ;;  %v27_v7 = vadd.f32 -0.4, %v15_v5 }
   0x7   :  { %v18_v8 = vmin.f32 %v26_v6, 6.0  ;;  %v19_v9 = vmin.f32 %v27_v7, 6.0 }
   0x9   :  { %20 = vst [vmem:[%s51_s1] sm:$0xff] %v18_v8  ;;  %21 = vst [vmem:[%s51_s1 + $0x8] sm:$0xff] %v19_v9 }

</bundles_post_ra>
